<compile_context>
chip_gen: v5e
topology: v5e:2x2
jax: 0.10.0
libtpu: 0.0.40
codegen_flags: <defaults>
</compile_context>

<pallas_src>
import functools

import jax
import jax.numpy as jnp
from jax.experimental import pallas as pl
from jax.experimental.pallas import tpu as pltpu


# ---------------------------------------------------------------------------
# Pass 1: per-feature column means of z and z'.
# Grid = (feature tile, batch tile); batch is the inner reduction axis.
# ---------------------------------------------------------------------------
def _colmean_kernel(z_ref, zt_ref, means_ref, sz_acc, szt_acc, *, inv_n):
    k = pl.program_id(1)

    @pl.when(k == 0)
    def _():
        sz_acc[...] = jnp.zeros_like(sz_acc)
        szt_acc[...] = jnp.zeros_like(szt_acc)

    sz_acc[...] += jnp.sum(z_ref[...].astype(jnp.float32), axis=0, keepdims=True)
    szt_acc[...] += jnp.sum(zt_ref[...].astype(jnp.float32), axis=0, keepdims=True)

    @pl.when(k == pl.num_programs(1) - 1)
    def _():
        means_ref[0:1, :] = sz_acc[...] * jnp.float32(inv_n)
        means_ref[1:2, :] = szt_acc[...] * jnp.float32(inv_n)


# ---------------------------------------------------------------------------
# Pass 2: center (and optionally cast to bf16), per-feature sum of squared
# deviations (f32, exact two-pass variance), invariance-loss partials.
# ---------------------------------------------------------------------------
def _center_kernel(z_ref, zt_ref, means_ref,
                   xc_ref, xct_ref, sumsq_ref, invp_ref,
                   ssq_z, ssq_t, inv_acc):
    k = pl.program_id(1)

    @pl.when(k == 0)
    def _():
        ssq_z[...] = jnp.zeros_like(ssq_z)
        ssq_t[...] = jnp.zeros_like(ssq_t)
        inv_acc[...] = jnp.zeros_like(inv_acc)

    z = z_ref[...].astype(jnp.float32)
    zt = zt_ref[...].astype(jnp.float32)
    xc = z - means_ref[0:1, :]
    xct = zt - means_ref[1:2, :]
    xc_ref[...] = xc.astype(xc_ref.dtype)
    xct_ref[...] = xct.astype(xct_ref.dtype)

    ssq_z[...] += jnp.sum(xc * xc, axis=0, keepdims=True)
    ssq_t[...] += jnp.sum(xct * xct, axis=0, keepdims=True)
    diff = z - zt
    inv_acc[...] += jnp.sum(diff * diff, keepdims=True)

    @pl.when(k == pl.num_programs(1) - 1)
    def _():
        sumsq_ref[0:1, :] = ssq_z[...]
        sumsq_ref[1:2, :] = ssq_t[...]
        invp_ref[...] = jnp.broadcast_to(inv_acc[...], invp_ref.shape)


# ---------------------------------------------------------------------------
# Pass 3: diagonal Gram tiles (single fetch per feature tile).  Per-tile
# off-diagonal Frobenius partial written to a lane-padded output row.
# ---------------------------------------------------------------------------
def _cov_diag_kernel(xc_ref, xct_ref, out_ref, gz_acc, gzt_acc):
    k = pl.program_id(1)

    @pl.when(k == 0)
    def _():
        gz_acc[...] = jnp.zeros_like(gz_acc)
        gzt_acc[...] = jnp.zeros_like(gzt_acc)

    contract = (((0,), (0,)), ((), ()))   # xc^T @ xc over the batch axis
    # TODO(synk): verify via pl.lower_as_mlir that this transposed-LHS Gram
    # lowers without a per-step relayout; if not, store xc in (D, N) layout.
    xc = xc_ref[...]
    xct = xct_ref[...]
    gz_acc[...] += jax.lax.dot_general(xc, xc, contract,
                                       preferred_element_type=jnp.float32)
    gzt_acc[...] += jax.lax.dot_general(xct, xct, contract,
                                        preferred_element_type=jnp.float32)

    @pl.when(k == pl.num_programs(1) - 1)
    def _():
        gz = gz_acc[...]
        gzt = gzt_acc[...]
        td = gz.shape[0]
        rows = jax.lax.broadcasted_iota(jnp.int32, (td, td), 0)
        cols = jax.lax.broadcasted_iota(jnp.int32, (td, td), 1)
        off = rows != cols                      # tile diagonal == global diagonal
        sq = gz * gz + gzt * gzt
        part = jnp.sum(jnp.where(off, sq, 0.0), keepdims=True)   # (1, 1)
        out_ref[...] = jnp.broadcast_to(part, out_ref.shape)


# ---------------------------------------------------------------------------
# Pass 4: strictly-upper Gram tiles (di < dj), enumerated via scalar-prefetched
# index tables.  Counted twice by symmetry.
# ---------------------------------------------------------------------------
def _cov_upper_kernel(di_tab, dj_tab,
                      xc_i_ref, xc_j_ref, xct_i_ref, xct_j_ref,
                      out_ref, gz_acc, gzt_acc):
    k = pl.program_id(1)

    @pl.when(k == 0)
    def _():
        gz_acc[...] = jnp.zeros_like(gz_acc)
        gzt_acc[...] = jnp.zeros_like(gzt_acc)

    contract = (((0,), (0,)), ((), ()))
    gz_acc[...] += jax.lax.dot_general(xc_i_ref[...], xc_j_ref[...], contract,
                                       preferred_element_type=jnp.float32)
    gzt_acc[...] += jax.lax.dot_general(xct_i_ref[...], xct_j_ref[...], contract,
                                        preferred_element_type=jnp.float32)

    @pl.when(k == pl.num_programs(1) - 1)
    def _():
        gz = gz_acc[...]
        gzt = gzt_acc[...]
        part = 2.0 * jnp.sum(gz * gz + gzt * gzt, keepdims=True)   # (1, 1)
        out_ref[...] = jnp.broadcast_to(part, out_ref.shape)


# ---------------------------------------------------------------------------
# Helpers.
# ---------------------------------------------------------------------------
def _pick_tile(dim, requested, candidates):
    if requested is not None:
        assert dim % requested == 0, (dim, requested)
        return int(requested)
    for c in candidates:
        if dim % c == 0:
            return c
    # TODO(synk): masked tail tile for ragged dims instead of one full-dim tile.
    return dim


def _mosaic_params(est_bytes, semantics):
    # Explicit scoped-VMEM budget: 2x the rough working-set estimate plus
    # headroom, floor 32 MiB, capped at 48 MiB (safe on v5e/v6e 128 MiB and
    # v7x 64 MiB physical VMEM).
    limit = int(min(max(2 * est_bytes + (8 << 20), 32 << 20), 48 << 20))
    return pltpu.CompilerParams(dimension_semantics=semantics,
                                vmem_limit_bytes=limit)


def vicreg_loss(predictions, target, *, eps, gamma, w_inv, w_var, w_conv,
                batch_tile=None, feat_tile=None, use_bf16_gram=False):
    """Same log dict as VICRegLoss.forward(test=True), plus 'loss'."""
    assert predictions.shape == target.shape and predictions.ndim == 2
    n, d = predictions.shape
    assert n >= 2, "VICReg variance/covariance need at least 2 samples (ddof=1)."

    predictions = predictions.astype(jnp.float32)
    target = target.astype(jnp.float32)

    # Batch tile: full-size MXU contraction (256/128 rows); tiny fallbacks
    # removed per review.  Feature tile: 512 by default (bandwidth lever).
    tn = _pick_tile(n, batch_tile, (256, 128))
    td = _pick_tile(d, feat_tile, (512, 256, 128))
    n_n = n // tn
    n_d = d // td

    gram_dtype = jnp.bfloat16 if use_bf16_gram else jnp.float32
    gsz = jnp.dtype(gram_dtype).itemsize

    # ---- pass 1: column means -------------------------------------------
    p1_bytes = 2 * (2 * tn * td * 4) + 2 * (1 * td * 4) + 2 * (2 * td * 4)
    means = pl.pallas_call(
        functools.partial(_colmean_kernel, inv_n=1.0 / n),
        out_shape=jax.ShapeDtypeStruct((2, d), jnp.float32),
        grid_spec=pltpu.PrefetchScalarGridSpec(
            num_scalar_prefetch=0,
            grid=(n_d, n_n),
            in_specs=[pl.BlockSpec((tn, td), lambda i, k: (k, i)),
                      pl.BlockSpec((tn, td), lambda i, k: (k, i))],
            out_specs=pl.BlockSpec((2, td), lambda i, k: (0, i)),
            scratch_shapes=[pltpu.VMEM((1, td), jnp.float32),
                            pltpu.VMEM((1, td), jnp.float32)]),
        compiler_params=_mosaic_params(p1_bytes, ("parallel", "arbitrary")),
    )(predictions, target)

    # ---- pass 2: center/cast + sumsq (variance) + invariance partials -----
    # TODO(synk): when n_d < 3, skip the centered HBM intermediate and have the
    # cov passes read raw z/z' + means directly (saves one N*D round trip).
    p2_bytes = (2 * (2 * tn * td * 4) + 2 * (2 * td * 4)
                + 2 * (2 * tn * td * gsz) + 2 * (2 * td * 4)
                + 2 * (8 * 128 * 4) + 2 * td * 4)
    xc, xct, sumsq, inv_parts = pl.pallas_call(
        _center_kernel,
        out_shape=(jax.ShapeDtypeStruct((n, d), gram_dtype),
                   jax.ShapeDtypeStruct((n, d), gram_dtype),
                   jax.ShapeDtypeStruct((2, d), jnp.float32),
                   jax.ShapeDtypeStruct((n_d, 8, 128), jnp.float32)),
        grid_spec=pltpu.PrefetchScalarGridSpec(
            num_scalar_prefetch=0,
            grid=(n_d, n_n),
            in_specs=[pl.BlockSpec((tn, td), lambda i, k: (k, i)),
                      pl.BlockSpec((tn, td), lambda i, k: (k, i)),
                      pl.BlockSpec((2, td), lambda i, k: (0, i))],
            out_specs=(pl.BlockSpec((tn, td), lambda i, k: (k, i)),
                       pl.BlockSpec((tn, td), lambda i, k: (k, i)),
                       pl.BlockSpec((2, td), lambda i, k: (0, i)),
                       pl.BlockSpec((1, 8, 128), lambda i, k: (i, 0, 0))),
            scratch_shapes=[pltpu.VMEM((1, td), jnp.float32),
                            pltpu.VMEM((1, td), jnp.float32),
                            pltpu.VMEM((1, 1), jnp.float32)]),
        compiler_params=_mosaic_params(p2_bytes, ("parallel", "arbitrary")),
    )(predictions, target, means)

    # ---- pass 3: diagonal cov tiles (no duplicate DMA) --------------------
    p3_bytes = 2 * (2 * tn * td * gsz) + 2 * td * td * 4
    diag_parts = pl.pallas_call(
        _cov_diag_kernel,
        out_shape=jax.ShapeDtypeStruct((n_d, 8, 128), jnp.float32),
        grid_spec=pltpu.PrefetchScalarGridSpec(
            num_scalar_prefetch=0,
            grid=(n_d, n_n),
            in_specs=[pl.BlockSpec((tn, td), lambda i, k: (k, i)),
                      pl.BlockSpec((tn, td), lambda i, k: (k, i))],
            out_specs=pl.BlockSpec((1, 8, 128), lambda i, k: (i, 0, 0)),
            scratch_shapes=[pltpu.VMEM((td, td), jnp.float32),
                            pltpu.VMEM((td, td), jnp.float32)]),
        compiler_params=_mosaic_params(p3_bytes, ("parallel", "arbitrary")),
    )(xc, xct)

    # ---- pass 4: strictly-upper cov tiles (skipped if single feature tile) -
    upper_sum = jnp.float32(0.0)
    if n_d >= 2:
        pairs = [(i, j) for i in range(n_d) for j in range(i + 1, n_d)]
        di_tab = jnp.asarray([p[0] for p in pairs], dtype=jnp.int32)
        dj_tab = jnp.asarray([p[1] for p in pairs], dtype=jnp.int32)
        n_tri = len(pairs)

        col_i = pl.BlockSpec((tn, td), lambda t, k, di, dj: (k, di[t]))
        col_j = pl.BlockSpec((tn, td), lambda t, k, di, dj: (k, dj[t]))

        p4_bytes = 4 * (2 * tn * td * gsz) + 2 * td * td * 4
        upper_parts = pl.pallas_call(
            _cov_upper_kernel,
            out_shape=jax.ShapeDtypeStruct((n_tri, 8, 128), jnp.float32),
            grid_spec=pltpu.PrefetchScalarGridSpec(
                num_scalar_prefetch=2,
                grid=(n_tri, n_n),
                in_specs=[col_i, col_j, col_i, col_j],
                out_specs=pl.BlockSpec((1, 8, 128),
                                       lambda t, k, di, dj: (t, 0, 0)),
                scratch_shapes=[pltpu.VMEM((td, td), jnp.float32),
                                pltpu.VMEM((td, td), jnp.float32)]),
            compiler_params=_mosaic_params(p4_bytes, ("parallel", "arbitrary")),
        )(di_tab, dj_tab, xc, xc, xct, xct)
        upper_sum = jnp.sum(upper_parts[:, 0, 0])

    # ---- tiny final combine in plain JAX ----------------------------------
    inv_loss = jnp.sum(inv_parts[:, 0, 0]) / jnp.float32(n * d)

    sigma = jnp.sqrt(sumsq / jnp.float32(n - 1) + jnp.float32(eps))   # (2, d), f32
    hinge = jnp.maximum(0.0, jnp.float32(gamma) - sigma)
    var_loss = jnp.mean(hinge[0]) + jnp.mean(hinge[1])

    cov_frob = jnp.sum(diag_parts[:, 0, 0]) + upper_sum
    cov_loss = cov_frob / jnp.float32(d * (n - 1) ** 2)

    loss = (jnp.float32(w_inv) * inv_loss + jnp.float32(w_var) * var_loss
            + jnp.float32(w_conv) * cov_loss)
    return {"inv_loss": inv_loss, "var_loss": var_loss,
            "cov_loss": cov_loss, "loss": loss}


# ---------------------------------------------------------------------------
# Plain-JAX reference mirroring the PyTorch module (for verification only).
# ---------------------------------------------------------------------------
def _vicreg_loss_ref(z, zt, *, eps, gamma, w_inv, w_var, w_conv):
    n, d = z.shape
    inv = jnp.mean((z - zt) ** 2)

    def var_single(x):
        sigma = jnp.sqrt(jnp.var(x, axis=0, ddof=1) + eps)
        return jnp.mean(jnp.maximum(0.0, gamma - sigma))

    def cov_single(x):
        xc = x - jnp.mean(x, axis=0, keepdims=True)
        cov = jnp.dot(xc.T, xc, precision=jax.lax.Precision.HIGHEST) / (n - 1)
        off = cov - jnp.diag(jnp.diag(cov))
        return jnp.sum(off ** 2) / d

    var_l = var_single(z) + var_single(zt)
    cov_l = cov_single(z) + cov_single(zt)
    loss = w_inv * inv + w_var * var_l + w_conv * cov_l
    return {"inv_loss": inv, "var_loss": var_l, "cov_loss": cov_l, "loss": loss}


if __name__ == "__main__":
    hp = dict(eps=1e-4, gamma=1.0, w_inv=25.0, w_var=25.0, w_conv=1.0)
    key = jax.random.PRNGKey(0)

    configs = [
        (8, 32, {}),                                      # tiny, single-tile path
        (256, 512, dict(batch_tile=128, feat_tile=128)),  # multi-tile + upper pass
        (256, 512, {}),                                   # default (large) tiles
    ]
    preds = tgt = None
    for idx, (n, d, tiles) in enumerate(configs):
        k1, k2 = jax.random.split(jax.random.fold_in(key, idx))
        preds = jax.random.normal(k1, (n, d), dtype=jnp.float32)
        tgt = preds + 0.1 * jax.random.normal(k2, (n, d), dtype=jnp.float32)

        out = vicreg_loss(preds, tgt, **hp, **tiles)
        out = {kk: jax.block_until_ready(v) for kk, v in out.items()}
        ref = _vicreg_loss_ref(preds, tgt, **hp)
        for kk in ("inv_loss", "var_loss", "cov_loss", "loss"):
            assert jnp.allclose(out[kk], ref[kk], rtol=1e-3, atol=1e-5), (
                n, d, kk, float(out[kk]), float(ref[kk]))

    # bf16 centered intermediate (v6e/v7x MXU fast path): invariance/variance
    # stay f32 (tight check); covariance inherits bf16 rounding (loose check).
    out_bf16 = vicreg_loss(preds, tgt, **hp, batch_tile=128, feat_tile=128,
                           use_bf16_gram=True)
    out_bf16 = {kk: jax.block_until_ready(v) for kk, v in out_bf16.items()}
    ref = _vicreg_loss_ref(preds, tgt, **hp)
    assert jnp.allclose(out_bf16["inv_loss"], ref["inv_loss"], rtol=1e-3, atol=1e-5)
    assert jnp.allclose(out_bf16["var_loss"], ref["var_loss"], rtol=1e-3, atol=1e-5)
    assert jnp.allclose(out_bf16["cov_loss"], ref["cov_loss"], rtol=5e-2, atol=1e-4)
    assert jnp.allclose(out_bf16["loss"], ref["loss"], rtol=5e-2, atol=1e-4)

    print("KERNEL_OK")
</pallas_src>

<mosaic_0001>
module attributes {stable_mosaic.version = 11 : i64} {
  func.func @_colmean_kernel(%arg0: i32, %arg1: i32, %arg2: memref<8x32xf32, #tpu.memory_space<vmem>>, %arg3: memref<8x32xf32, #tpu.memory_space<vmem>>, %arg4: memref<2x32xf32, #tpu.memory_space<vmem>>, %arg5: memref<1x32xf32, #tpu.memory_space<vmem>>, %arg6: memref<1x32xf32, #tpu.memory_space<vmem>>) attributes {dimension_semantics = [#tpu.dimension_semantics<parallel>, #tpu.dimension_semantics<arbitrary>], iteration_bounds = array<i64: 1, 1>, scalar_prefetch = 0 : i64, scratch_operands = 2 : i64, tpu.core_type = #tpu.core_type<tc>, window_params = [{transform_indices = @transform_0, window_bounds = array<i64: 8, 32>}, {transform_indices = @transform_1, window_bounds = array<i64: 8, 32>}, {transform_indices = @transform_2, window_bounds = array<i64: 2, 32>}]} {
    %c0_i32 = arith.constant 0 : i32
    %0 = arith.cmpi eq, %arg1, %c0_i32 : i32
    %1 = arith.extui %0 : i1 to i32
    %c0_i32_0 = arith.constant 0 : i32
    %2 = arith.cmpi ne, %1, %c0_i32_0 : i32
    scf.if %2 {
      %cst_15 = arith.constant 0.000000e+00 : f32
      %18 = vector.broadcast %cst_15 : f32 to vector<1x32xf32>
      %c0_16 = arith.constant 0 : index
      %c0_17 = arith.constant 0 : index
      %19 = vector.load %arg5[%c0_16, %c0_17] : memref<1x32xf32, #tpu.memory_space<vmem>>, vector<1x32xf32>
      tpu.vector_store %arg5[%c0_16, %c0_17], %18 {strides = array<i32>} : memref<1x32xf32, #tpu.memory_space<vmem>>, vector<1x32xf32>,
      %cst_18 = arith.constant 0.000000e+00 : f32
      %20 = vector.broadcast %cst_18 : f32 to vector<1x32xf32>
      %c0_19 = arith.constant 0 : index
      %c0_20 = arith.constant 0 : index
      %21 = vector.load %arg6[%c0_19, %c0_20] : memref<1x32xf32, #tpu.memory_space<vmem>>, vector<1x32xf32>
      tpu.vector_store %arg6[%c0_19, %c0_20], %20 {strides = array<i32>} : memref<1x32xf32, #tpu.memory_space<vmem>>, vector<1x32xf32>,
    } else {
    }
    %c0 = arith.constant 0 : index
    %c0_1 = arith.constant 0 : index
    %3 = vector.load %arg5[%c0, %c0_1] : memref<1x32xf32, #tpu.memory_space<vmem>>, vector<1x32xf32>
    %c0_2 = arith.constant 0 : index
    %c0_3 = arith.constant 0 : index
    %4 = vector.load %arg2[%c0_2, %c0_3] : memref<8x32xf32, #tpu.memory_space<vmem>>, vector<8x32xf32>
    %cst = arith.constant dense<0.000000e+00> : vector<32xf32>
    %5 = vector.multi_reduction <add>, %4, %cst [0] : vector<8x32xf32> to vector<32xf32>
    %6 = vector.shape_cast %5 : vector<32xf32> to vector<1x32xf32>
    %7 = arith.addf %3, %6 : vector<1x32xf32>
    %c0_4 = arith.constant 0 : index
    %c0_5 = arith.constant 0 : index
    %8 = vector.load %arg5[%c0_4, %c0_5] : memref<1x32xf32, #tpu.memory_space<vmem>>, vector<1x32xf32>
    tpu.vector_store %arg5[%c0_4, %c0_5], %7 {strides = array<i32>} : memref<1x32xf32, #tpu.memory_space<vmem>>, vector<1x32xf32>,
    %c0_6 = arith.constant 0 : index
    %c0_7 = arith.constant 0 : index
    %9 = vector.load %arg6[%c0_6, %c0_7] : memref<1x32xf32, #tpu.memory_space<vmem>>, vector<1x32xf32>
    %c0_8 = arith.constant 0 : index
    %c0_9 = arith.constant 0 : index
    %10 = vector.load %arg3[%c0_8, %c0_9] : memref<8x32xf32, #tpu.memory_space<vmem>>, vector<8x32xf32>
    %cst_10 = arith.constant dense<0.000000e+00> : vector<32xf32>
    %11 = vector.multi_reduction <add>, %10, %cst_10 [0] : vector<8x32xf32> to vector<32xf32>
    %12 = vector.shape_cast %11 : vector<32xf32> to vector<1x32xf32>
    %13 = arith.addf %9, %12 : vector<1x32xf32>
    %c0_11 = arith.constant 0 : index
    %c0_12 = arith.constant 0 : index
    %14 = vector.load %arg6[%c0_11, %c0_12] : memref<1x32xf32, #tpu.memory_space<vmem>>, vector<1x32xf32>
    tpu.vector_store %arg6[%c0_11, %c0_12], %13 {strides = array<i32>} : memref<1x32xf32, #tpu.memory_space<vmem>>, vector<1x32xf32>,
    %c0_i32_13 = arith.constant 0 : i32
    %15 = arith.cmpi eq, %arg1, %c0_i32_13 : i32
    %16 = arith.extui %15 : i1 to i32
    %c0_i32_14 = arith.constant 0 : i32
    %17 = arith.cmpi ne, %16, %c0_i32_14 : i32
    scf.if %17 {
      %c0_15 = arith.constant 0 : index
      %c0_16 = arith.constant 0 : index
      %18 = vector.load %arg5[%c0_15, %c0_16] : memref<1x32xf32, #tpu.memory_space<vmem>>, vector<1x32xf32>
      %cst_17 = arith.constant 1.250000e-01 : f32
      %19 = vector.broadcast %cst_17 : f32 to vector<1x32xf32>
      %20 = arith.mulf %18, %19 : vector<1x32xf32>
      %c0_18 = arith.constant 0 : index
      %c0_19 = arith.constant 0 : index
      %21 = vector.load %arg4[%c0_18, %c0_19] : memref<2x32xf32, #tpu.memory_space<vmem>>, vector<1x32xf32>
      tpu.vector_store %arg4[%c0_18, %c0_19], %20 {strides = array<i32>} : memref<2x32xf32, #tpu.memory_space<vmem>>, vector<1x32xf32>,
      %c0_20 = arith.constant 0 : index
      %c0_21 = arith.constant 0 : index
      %22 = vector.load %arg6[%c0_20, %c0_21] : memref<1x32xf32, #tpu.memory_space<vmem>>, vector<1x32xf32>
      %cst_22 = arith.constant 1.250000e-01 : f32
      %23 = vector.broadcast %cst_22 : f32 to vector<1x32xf32>
      %24 = arith.mulf %22, %23 : vector<1x32xf32>
      %c1 = arith.constant 1 : index
      %c0_23 = arith.constant 0 : index
      %25 = vector.load %arg4[%c1, %c0_23] : memref<2x32xf32, #tpu.memory_space<vmem>>, vector<1x32xf32>
      tpu.vector_store %arg4[%c1, %c0_23], %24 {strides = array<i32>} : memref<2x32xf32, #tpu.memory_space<vmem>>, vector<1x32xf32>,
    } else {
    }
    return
  }
  func.func @transform_0(%arg0: i32, %arg1: i32) -> (i32, i32) {
    %c0_i32 = arith.constant 0 : i32
    return %arg1, %arg0 : i32, i32
  }
  func.func @transform_1(%arg0: i32, %arg1: i32) -> (i32, i32) {
    %c0_i32 = arith.constant 0 : i32
    return %arg1, %arg0 : i32, i32
  }
  func.func @transform_2(%arg0: i32, %arg1: i32) -> (i32, i32) {
    %c0_i32 = arith.constant 0 : i32
    %c0_i32_0 = arith.constant 0 : i32
    return %c0_i32, %arg0 : i32, i32
  }
}

</mosaic_0001>

<bundles_post_ra>
// kernel: tpu_custom_call.1
= control target key start
LH: loop header
LB: loop body
LE: loop exit
PB: predicated region body
PF: predicated region fallthrough
CT: control target
= control target key end

     0   :  { %7 = vsyncpa [#allocation5], 0  ;;  %s214_s0 = inlined_call_operand.hbm [shape: f32[8,32], index: 0, kind: input, shape index: {}]   ;;  %s215_s1 = inlined_call_operand.hbm [shape: f32[8,32], index: 1, kind: input, shape index: {}]   ;;  %s216_s2 = inlined_call_operand.hbm [shape: f32[2,32], index: 2, kind: output, shape index: {}]  }
   0x1   :  { %8 = vsyncpa [#allocation8], 0 }
   0x2   :  { %9 = vsyncpa [#allocation6], 0  ;;  %s15_s11 = sshll.u32 %s214_s0, 4  ;;  %s180_s12 = smov [#allocation4]   ;;  %s16_s11 = int_to_ptr.hbm [resolvable:$true] %s15_s11 }
   0x3   :  { %s17_s13 = sshll.u32 %s180_s12, 4  ;;  %s26_s16 = sshll.u32 %s215_s1, 4  ;;  %s18_s13 = int_to_ptr.vmem [resolvable:$true] %s17_s13  ;;  %s27_s16 = int_to_ptr.hbm [resolvable:$true] %s26_s16 }
   0x4   :  { %20 = dma.hbm_to_vmem [thread:$0]  %s16_s11, 128, %s18_s13, [#allocation5]  }
   0x5   :  { %s181_s17 = smov [#allocation7]  }
   0x6   :  { %s28_s18 = sshll.u32 %s181_s17, 4  ;;  %s29_s18 = int_to_ptr.vmem [resolvable:$true] %s28_s18 }
   0x7   :  { %31 = dma.hbm_to_vmem [thread:$0]  %s27_s16, 128, %s29_s18, [#allocation8]  }
   0x8   :  { %174 = dma.done.wait [#allocation5], 128  }
   0x9   :  { %175 = vsyncadd [#allocation5], 4294967168 }
   0xa   :  { %176 = dma.done.wait [#allocation8], 128  }
   0xb   :  { %177 = vsyncadd [#allocation8], 4294967168  ;;  %vm44_vm0 = vcmask 253952   ;;  %v182_v0 = vmov 0.0   ;;  %vm49_vm1 = vcmask 261120   ;;  %v48_v1 = vld [vmem:[#allocation4] sm:$0xff] }
   0xc   :  { %45 = vst.msk [vmem:[#allocation2] sm:$0x1] %vm44_vm0, %v182_v0  ;;  %v61_v2 = vld [vmem:[#allocation7] sm:$0xff]  ;;  %v50_v3 = vsel %vm49_vm1, %v48_v1, 0.0  ;;  %s183_s0 = smov [#allocation9]   ;;  %s87_s21 = sshll.u32 %s216_s2, 4  ;;  %s88_s21 = int_to_ptr.hbm [resolvable:$true] %s87_s21 }
   0xd   :  { %46 = vst.msk [vmem:[#allocation3] sm:$0x1] %vm44_vm0, %v182_v0  ;;  %v62_v4 = vsel %vm49_vm1, %v61_v2, 0.0  ;;  %v51_v5 = vrot.slane %v50_v3, 4  ;;  %s85_s1 = sshll.u32 %s183_s0, 4  ;;  %s86_s1 = int_to_ptr.vmem [resolvable:$true] %s85_s1 }
   0xe   :  { %v63_v6 = vrot.slane %v62_v4, 4 }
   0xf   :  { %v52_v7 = vadd.f32 %v51_v5, %v50_v3 }
  0x10   :  { %v64_v8 = vadd.f32 %v63_v6, %v62_v4 }
  0x11   :  { %v53_v9 = vrot.slane %v52_v7, 2 }
  0x12   :  { %v65_v10 = vrot.slane %v64_v8, 2 }
  0x13   :  { %v54_v11 = vadd.f32 %v53_v9, %v52_v7  ;;  %v47_v15 = vld [vmem:[#allocation2] sm:$0x1] }
  0x14   :  { %v66_v12 = vadd.f32 %v65_v10, %v64_v8  ;;  %v60_v16 = vld [vmem:[#allocation3] sm:$0x1] }
  0x15   :  { %v55_v13 = vrot.slane %v54_v11, 1 }
  0x16   :  { %v67_v14 = vrot.slane %v66_v12, 1 }
  0x17   :  { %v56_v17 = vadd.f32 %v55_v13, %v54_v11 }
  0x18   :  { %v68_v18 = vadd.f32 %v67_v14, %v66_v12 }
  0x19   :  { %v57_v19 = vadd.f32 %v56_v17, %v47_v15 }
  0x1a   :  { %v69_v20 = vadd.f32 %v68_v18, %v60_v16 }
  0x1b   :  { %59 = vst.msk [vmem:[#allocation2] sm:$0x1] %vm44_vm0, %v57_v19 }
  0x1c   :  { %70 = vst.msk [vmem:[#allocation3] sm:$0x1] %vm44_vm0, %v69_v20 }
  0x22   :  { %v74_v21 = vld [vmem:[#allocation2] sm:$0x1] }
  0x23   :  { %v75_v22 = vmul.f32 0.125, %v74_v21  ;;  %v77_v23 = vld [vmem:[#allocation3] sm:$0x1] }
  0x24   :  { %v78_v24 = vmul.f32 0.125, %v77_v23 }
  0x25   :  { %76 = vst.msk [vmem:[#allocation9] sm:$0x1] %vm44_vm0, %v75_v22 }
  0x26   :  { %79 = vst.msk [vmem:[#allocation9 + $0x1] sm:$0x1] %vm44_vm0, %v78_v24 }
  0x27   :  { %90 = dma.vmem_to_hbm [thread:$0]  %s86_s1, 32, %s88_s21, [#allocation6]  }
  0x28   :  { %178 = dma.done.wait [#allocation6], 32  }
  0x29   :  { %179 = vsyncadd [#allocation6], 4294967264 }
  0x2a   :  { %95 = vsyncpa [#allocation5], 1 }
  0x2b   :  { %96 = vsyncpa [#allocation8], 1 }
  0x2c   :  { %97 = vsyncpa [#allocation6], 1 }

</bundles_post_ra>
